<compile_context>
chip_gen: v5e
topology: v5e:2x2
jax: 0.10.0
libtpu: 0.0.40
codegen_flags: <defaults>
</compile_context>

<pallas_src>
import math
from functools import partial

import jax
import jax.numpy as jnp
from jax.experimental import pallas as pl
from jax.experimental.pallas import tpu as pltpu


def _vmem_limit_bytes():
    """Generation-aware scoped-VMEM budget: ~112 MiB on 128-MiB parts (v5e/v6e),
    ~56 MiB on 64-MiB parts (v7x); conservative fallback if the query fails."""
    try:
        cap = int(pltpu.get_tpu_info().vmem_capacity_bytes)
    except Exception:
        cap = 64 * 1024 * 1024
    return max(32 * 1024 * 1024, min(cap - 8 * 1024 * 1024, 112 * 1024 * 1024))


_VMEM_LIMIT = _vmem_limit_bytes()


def _tile(extent, block):
    # Full extent when small (always a legal block); otherwise the requested block
    # (block_rows multiple of 8, block_cols/block_inter multiples of 128).
    return extent if extent <= block else block


# ---------------------------------------------------------------------------
# Kernel A: fused RMSNorm + projection (+bias), N-tiled.  Used for QKV proj.
# ---------------------------------------------------------------------------
def _rmsnorm_matmul_kernel(x_ref, g_ref, w_ref, b_ref, o_ref, *, eps):
    x = x_ref[...]
    xf = x.astype(jnp.float32)
    var = jnp.mean(xf * xf, axis=-1, keepdims=True)
    xn = (xf * jax.lax.rsqrt(var + eps) * g_ref[...].astype(jnp.float32)).astype(x.dtype)
    acc = jnp.dot(xn, w_ref[...], preferred_element_type=jnp.float32)
    o_ref[...] = (acc + b_ref[...].astype(jnp.float32)).astype(o_ref.dtype)


def rmsnorm_matmul(x2d, gamma, w, b, *, eps, block_rows=256, block_cols=512):
    R, H = x2d.shape
    N = w.shape[1]
    tm = _tile(R, block_rows)
    tn = _tile(N, block_cols)
    return pl.pallas_call(
        partial(_rmsnorm_matmul_kernel, eps=eps),
        out_shape=jax.ShapeDtypeStruct((R, N), x2d.dtype),
        grid_spec=pltpu.PrefetchScalarGridSpec(
            num_scalar_prefetch=0,
            grid=(pl.cdiv(R, tm), pl.cdiv(N, tn)),
            in_specs=[
                pl.BlockSpec((tm, H), lambda i, j: (i, 0)),
                pl.BlockSpec((1, H), lambda i, j: (0, 0)),
                pl.BlockSpec((H, tn), lambda i, j: (0, j)),
                pl.BlockSpec((1, tn), lambda i, j: (0, j)),
            ],
            out_specs=pl.BlockSpec((tm, tn), lambda i, j: (i, j)),
        ),
        compiler_params=pltpu.CompilerParams(
            dimension_semantics=("parallel", "parallel"),
            vmem_limit_bytes=_VMEM_LIMIT),
    )(x2d, gamma.reshape(1, H), w, b.reshape(1, N))


# ---------------------------------------------------------------------------
# Kernel B: RoPE + causal attention.  One batch (all heads) per grid step.
# Reads q/k/v directly from the (R, 3H) qkv buffer, writes an (R, H) output.
# TODO(synk): attention dropout (p=0.1, training mode) omitted — eval forward.
# ---------------------------------------------------------------------------
def _attention_kernel(qkv_ref, cos_ref, sin_ref, *rest, num_heads, scale, has_mask):
    if has_mask:
        m_ref, o_ref = rest
    else:
        (o_ref,) = rest

    S, H3 = qkv_ref.shape
    H = H3 // 3
    hd = H // num_heads

    qkv = qkv_ref[...]
    dt = qkv.dtype
    cos = cos_ref[0].astype(jnp.float32)[None]   # (1, S, hd), kept in f32
    sin = sin_ref[0].astype(jnp.float32)[None]

    def split_heads(cols):                       # (S, H) -> (h, S, hd)
        return jnp.swapaxes(cols.reshape(S, num_heads, hd), 0, 1)

    q = split_heads(qkv[:, :H])
    k = split_heads(qkv[:, H:2 * H])
    v = split_heads(qkv[:, 2 * H:])

    def rope(x):
        xf = x.astype(jnp.float32)
        x1 = xf[..., : hd // 2]
        x2 = xf[..., hd // 2:]
        return xf * cos + jnp.concatenate([-x2, x1], axis=-1) * sin

    # Fold the 1/sqrt(hd) scale into q (S*hd multiplies instead of S*S).
    q = (rope(q) * scale).astype(dt)
    k = rope(k).astype(dt)

    s = jnp.einsum('hqd,hkd->hqk', q, k, preferred_element_type=jnp.float32)

    if has_mask:
        s = s + m_ref[...].reshape(1, S, S).astype(jnp.float32)
    else:
        # In-kernel causal mask (is_causal=True) — no SxS HBM mask traffic.
        row = jax.lax.broadcasted_iota(jnp.int32, (S, S), 0)
        col = jax.lax.broadcasted_iota(jnp.int32, (S, S), 1)
        s = s + jnp.where(col <= row, 0.0, -1e9)[None].astype(jnp.float32)

    m = jnp.max(s, axis=-1, keepdims=True)
    p = jnp.exp(s - m)
    p = p * pl.reciprocal(jnp.sum(p, axis=-1, keepdims=True), approx=True)

    o = jnp.einsum('hqk,hkd->hqd', p.astype(dt), v, preferred_element_type=jnp.float32)
    o_ref[...] = jnp.swapaxes(o, 0, 1).reshape(S, H).astype(o_ref.dtype)


def rope_attention(qkv, cos, sin, mask, *, batch, seq, num_heads, scale):
    R, H3 = qkv.shape
    H = H3 // 3
    hd = cos.shape[-1]
    has_mask = mask is not None

    in_specs = [
        pl.BlockSpec((seq, H3), lambda b: (b, 0)),
        pl.BlockSpec((1, seq, hd), lambda b: (b, 0, 0)),
        pl.BlockSpec((1, seq, hd), lambda b: (b, 0, 0)),
    ]
    args = [qkv, cos, sin]
    if has_mask:
        in_specs.append(pl.BlockSpec((1, 1, seq, seq), lambda b: (b, 0, 0, 0)))
        args.append(mask)

    return pl.pallas_call(
        partial(_attention_kernel, num_heads=num_heads, scale=scale, has_mask=has_mask),
        out_shape=jax.ShapeDtypeStruct((R, H), qkv.dtype),
        grid_spec=pltpu.PrefetchScalarGridSpec(
            num_scalar_prefetch=0,
            grid=(batch,),
            in_specs=in_specs,
            out_specs=pl.BlockSpec((seq, H), lambda b: (b, 0)),
        ),
        compiler_params=pltpu.CompilerParams(
            dimension_semantics=("parallel",),
            vmem_limit_bytes=_VMEM_LIMIT),
    )(*args)


# ---------------------------------------------------------------------------
# Kernel C: projection (+bias) with residual add fused in (o_proj), N-tiled.
# ---------------------------------------------------------------------------
def _matmul_bias_residual_kernel(x_ref, w_ref, b_ref, r_ref, o_ref):
    acc = jnp.dot(x_ref[...], w_ref[...], preferred_element_type=jnp.float32)
    o_ref[...] = (acc + b_ref[...].astype(jnp.float32)
                  + r_ref[...].astype(jnp.float32)).astype(o_ref.dtype)


def matmul_bias_residual(x2d, w, b, resid2d, *, block_rows=256, block_cols=512):
    R, K = x2d.shape
    N = w.shape[1]
    tm = _tile(R, block_rows)
    tn = _tile(N, block_cols)
    return pl.pallas_call(
        _matmul_bias_residual_kernel,
        out_shape=jax.ShapeDtypeStruct((R, N), resid2d.dtype),
        grid_spec=pltpu.PrefetchScalarGridSpec(
            num_scalar_prefetch=0,
            grid=(pl.cdiv(R, tm), pl.cdiv(N, tn)),
            in_specs=[
                pl.BlockSpec((tm, K), lambda i, j: (i, 0)),
                pl.BlockSpec((K, tn), lambda i, j: (0, j)),
                pl.BlockSpec((1, tn), lambda i, j: (0, j)),
                pl.BlockSpec((tm, tn), lambda i, j: (i, j)),
            ],
            out_specs=pl.BlockSpec((tm, tn), lambda i, j: (i, j)),
        ),
        compiler_params=pltpu.CompilerParams(
            dimension_semantics=("parallel", "parallel"),
            vmem_limit_bytes=_VMEM_LIMIT),
    )(x2d, w, b.reshape(1, N), resid2d)


# ---------------------------------------------------------------------------
# Kernel D: RMSNorm + gate/up proj + SiLU*up + down_proj + residual, fully fused.
# Reduction over `inter` chunks with an f32 VMEM accumulator; the (R, inter)
# activation never hits HBM.  The RMSNorm'd input is cached in a VMEM scratch.
# ---------------------------------------------------------------------------
def _fused_mlp_kernel(x_ref, g_ref, wg_ref, bg_ref, wu_ref, bu_ref, wd_ref, bd_ref,
                      o_ref, xn_sc, acc_sc, *, eps):
    c = pl.program_id(1)

    @pl.when(c == 0)
    def _():
        xf = x_ref[...].astype(jnp.float32)
        var = jnp.mean(xf * xf, axis=-1, keepdims=True)
        xn = xf * jax.lax.rsqrt(var + eps) * g_ref[...].astype(jnp.float32)
        xn_sc[...] = xn.astype(xn_sc.dtype)
        acc_sc[...] = jnp.zeros_like(acc_sc)

    xn = xn_sc[...]
    gate = (jnp.dot(xn, wg_ref[...], preferred_element_type=jnp.float32)
            + bg_ref[...].astype(jnp.float32))
    up = (jnp.dot(xn, wu_ref[...], preferred_element_type=jnp.float32)
          + bu_ref[...].astype(jnp.float32))
    act = gate * (1.0 / (1.0 + jnp.exp(-gate))) * up          # silu(gate) * up, f32
    acc_sc[...] += jnp.dot(act.astype(x_ref.dtype), wd_ref[...],
                           preferred_element_type=jnp.float32)

    @pl.when(c == pl.num_programs(1) - 1)
    def _():
        o_ref[...] = (acc_sc[...] + bd_ref[...].astype(jnp.float32)
                      + x_ref[...].astype(jnp.float32)).astype(o_ref.dtype)


def rmsnorm_gated_mlp_down(x2d, gamma, wg, bg, wu, bu, wd, bd, *, eps,
                           block_rows=256, block_inter=512):
    R, H = x2d.shape
    inter = wg.shape[1]
    tm = _tile(R, block_rows)
    # Reduction-axis chunks must tile `inter` exactly (padded K-chunks would
    # corrupt the accumulator); otherwise fall back to the full extent.
    tc = block_inter if (inter > block_inter and inter % block_inter == 0) else inter
    return pl.pallas_call(
        partial(_fused_mlp_kernel, eps=eps),
        out_shape=jax.ShapeDtypeStruct((R, H), x2d.dtype),
        grid_spec=pltpu.PrefetchScalarGridSpec(
            num_scalar_prefetch=0,
            grid=(pl.cdiv(R, tm), pl.cdiv(inter, tc)),
            in_specs=[
                pl.BlockSpec((tm, H), lambda i, c: (i, 0)),
                pl.BlockSpec((1, H), lambda i, c: (0, 0)),
                pl.BlockSpec((H, tc), lambda i, c: (0, c)),
                pl.BlockSpec((1, tc), lambda i, c: (0, c)),
                pl.BlockSpec((H, tc), lambda i, c: (0, c)),
                pl.BlockSpec((1, tc), lambda i, c: (0, c)),
                pl.BlockSpec((tc, H), lambda i, c: (c, 0)),
                pl.BlockSpec((1, H), lambda i, c: (0, 0)),
            ],
            out_specs=pl.BlockSpec((tm, H), lambda i, c: (i, 0)),
            scratch_shapes=[pltpu.VMEM((tm, H), x2d.dtype),
                            pltpu.VMEM((tm, H), jnp.float32)],
        ),
        compiler_params=pltpu.CompilerParams(
            dimension_semantics=("parallel", "arbitrary"),
            vmem_limit_bytes=_VMEM_LIMIT),
        input_output_aliases={0: 0},   # h1 buffer reused for the layer output
    )(x2d, gamma.reshape(1, H), wg, bg.reshape(1, inter), wu, bu.reshape(1, inter),
      wd, bd.reshape(1, H))


# ---------------------------------------------------------------------------
# Parameter prep (one-time): fuse Q/K/V weights & biases so the per-call forward
# never materializes fresh concatenated weight copies in HBM.
# ---------------------------------------------------------------------------
def prepare_params(params):
    p = dict(params)
    p['wqkv'] = jnp.concatenate([params['wq'], params['wk'], params['wv']], axis=1)
    p['bqkv'] = jnp.concatenate([params['bq'], params['bk'], params['bv']], axis=0)
    return p


# ---------------------------------------------------------------------------
# Full decoder-layer forward (wrapper composing the kernels above).
# ---------------------------------------------------------------------------
def llama_decoder_layer(hidden_states, params, attention_mask=None, position_ids=None,
                        *, num_heads=4, rope_theta=0.2, eps=1e-6,
                        block_rows=256, block_cols=512):
    B, S, H = hidden_states.shape
    hd = H // num_heads
    R = B * S
    x2d = hidden_states.reshape(R, H)

    wqkv = params.get('wqkv')
    if wqkv is None:   # fallback if prepare_params was not called
        wqkv = jnp.concatenate([params['wq'], params['wk'], params['wv']], axis=1)
        bqkv = jnp.concatenate([params['bq'], params['bk'], params['bv']], axis=0)
    else:
        bqkv = params['bqkv']

    # --- A: input RMSNorm fused into concatenated QKV projection ---
    qkv = rmsnorm_matmul(x2d, params['ln1'], wqkv, bqkv, eps=eps,
                         block_rows=block_rows, block_cols=block_cols)

    # RoPE cos/sin tables (tiny precompute, kept in f32 for precision).
    if position_ids is None:
        position_ids = jnp.broadcast_to(jnp.arange(S, dtype=jnp.int32)[None, :], (B, S))
    inv_freq = 1.0 / (rope_theta ** (jnp.arange(0, hd, 2, dtype=jnp.float32) / hd))
    freqs = position_ids.astype(jnp.float32)[:, :, None] * inv_freq[None, None, :]
    emb = jnp.concatenate([freqs, freqs], axis=-1)
    cos = jnp.cos(emb)                       # (B, S, hd) f32
    sin = jnp.sin(emb)

    # If no additive mask is provided we apply the causal mask in-kernel
    # (LlamaAttention.is_causal=True); an explicit mask is passed through as-is.
    mask = None if attention_mask is None else attention_mask[:, :, :, :S].astype(jnp.float32)

    # --- B: RoPE + attention, reading q/k/v straight out of the qkv buffer ---
    attn2d = rope_attention(qkv, cos, sin, mask, batch=B, seq=S,
                            num_heads=num_heads, scale=1.0 / math.sqrt(hd))

    # --- C: o_proj with the first residual add fused in ---
    h1 = matmul_bias_residual(attn2d, params['wo'], params['bo'], x2d,
                              block_rows=block_rows, block_cols=block_cols)

    # --- D: post-attn RMSNorm + gated MLP + down_proj + second residual, fused ---
    out2d = rmsnorm_gated_mlp_down(h1, params['ln2'],
                                   params['wg'], params['bg'],
                                   params['wu'], params['bu'],
                                   params['wd'], params['bd'],
                                   eps=eps, block_rows=block_rows, block_inter=block_cols)
    return out2d.reshape(B, S, H)


# ---------------------------------------------------------------------------
# Pure-JAX reference (mirrors the PyTorch module, eval mode; causal when no mask).
# ---------------------------------------------------------------------------
def _reference_decoder_layer(x, params, attention_mask, position_ids,
                             *, num_heads, rope_theta, eps):
    P = jax.lax.Precision.HIGHEST
    B, S, H = x.shape
    hd = H // num_heads

    def rmsnorm(h, w):
        hf = h.astype(jnp.float32)
        var = jnp.mean(hf * hf, axis=-1, keepdims=True)
        hf = hf * jax.lax.rsqrt(var + eps)
        return w * hf.astype(h.dtype)

    def heads(t):
        return t.reshape(B, S, num_heads, hd).transpose(0, 2, 1, 3)

    hn = rmsnorm(x, params['ln1'])
    q = heads(jnp.dot(hn, params['wq'], precision=P) + params['bq'])
    k = heads(jnp.dot(hn, params['wk'], precision=P) + params['bk'])
    v = heads(jnp.dot(hn, params['wv'], precision=P) + params['bv'])

    inv_freq = 1.0 / (rope_theta ** (jnp.arange(0, hd, 2, dtype=jnp.float32) / hd))
    freqs = position_ids.astype(jnp.float32)[:, :, None] * inv_freq[None, None, :]
    emb = jnp.concatenate([freqs, freqs], axis=-1)
    cos = jnp.cos(emb)[:, None, :, :]
    sin = jnp.sin(emb)[:, None, :, :]

    def rot(t):
        t1, t2 = t[..., : hd // 2], t[..., hd // 2:]
        return jnp.concatenate([-t2, t1], axis=-1)

    q = (q * cos + rot(q) * sin).astype(x.dtype)
    k = (k * cos + rot(k) * sin).astype(x.dtype)

    s = jnp.einsum('bhqd,bhkd->bhqk', q, k, precision=P) / math.sqrt(hd)
    if attention_mask is not None:
        s = s + attention_mask[:, :, :, :S]
    else:
        causal = jnp.where(jnp.arange(S)[None, :] <= jnp.arange(S)[:, None], 0.0, -1e9)
        s = s + causal[None, None]
    p = jax.nn.softmax(s.astype(jnp.float32), axis=-1).astype(q.dtype)
    o = jnp.einsum('bhqk,bhkd->bhqd', p, v, precision=P)
    o = o.transpose(0, 2, 1, 3).reshape(B, S, H)
    o = jnp.dot(o, params['wo'], precision=P) + params['bo']
    h1 = x + o

    hn2 = rmsnorm(h1, params['ln2'])
    g = jnp.dot(hn2, params['wg'], precision=P) + params['bg']
    u = jnp.dot(hn2, params['wu'], precision=P) + params['bu']
    d = jnp.dot(jax.nn.silu(g) * u, params['wd'], precision=P) + params['bd']
    return h1 + d


if __name__ == "__main__":
    key = jax.random.PRNGKey(0)
    B, S, H, num_heads = 2, 8, 128, 4
    hd = H // num_heads
    inter = 2 * H
    eps = 1e-6
    rope_theta = 0.2  # matches the LlamaDecoderLayer default in the spec

    keys = jax.random.split(key, 16)

    def init(k, shape, scale=0.05):
        return scale * jax.random.normal(k, shape, dtype=jnp.float32)

    params = {
        'ln1': jnp.ones((H,), jnp.float32),
        'ln2': jnp.ones((H,), jnp.float32),
        'wq': init(keys[0], (H, H)), 'bq': init(keys[1], (H,)),
        'wk': init(keys[2], (H, H)), 'bk': init(keys[3], (H,)),
        'wv': init(keys[4], (H, H)), 'bv': init(keys[5], (H,)),
        'wo': init(keys[6], (H, H)), 'bo': init(keys[7], (H,)),
        'wg': init(keys[8], (H, inter)), 'bg': init(keys[9], (inter,)),
        'wu': init(keys[10], (H, inter)), 'bu': init(keys[11], (inter,)),
        'wd': init(keys[12], (inter, H)), 'bd': init(keys[13], (H,)),
    }
    params = prepare_params(params)   # one-time QKV weight/bias fusion

    x = jax.random.normal(keys[14], (B, S, H), dtype=jnp.float32)
    position_ids = jnp.broadcast_to(jnp.arange(S, dtype=jnp.int32)[None, :], (B, S))
    causal = jnp.where(jnp.arange(S)[None, :] <= jnp.arange(S)[:, None],
                       0.0, -1e9).astype(jnp.float32)
    attention_mask = jnp.broadcast_to(causal[None, None, :, :], (B, 1, S, S))

    ref = _reference_decoder_layer(x, params, None, position_ids,
                                   num_heads=num_heads, rope_theta=rope_theta, eps=eps)

    # Path 1: no explicit mask -> in-kernel causal mask.
    out = llama_decoder_layer(x, params, attention_mask=None, position_ids=position_ids,
                              num_heads=num_heads, rope_theta=rope_theta, eps=eps)
    out = jax.block_until_ready(out)
    assert out.shape == ref.shape and out.dtype == ref.dtype
    assert jnp.allclose(out, ref, atol=3e-3, rtol=3e-3), float(jnp.max(jnp.abs(out - ref)))

    # Path 2: explicit additive causal mask passed into the kernel.
    out2 = llama_decoder_layer(x, params, attention_mask=attention_mask,
                               position_ids=position_ids,
                               num_heads=num_heads, rope_theta=rope_theta, eps=eps)
    out2 = jax.block_until_ready(out2)
    assert jnp.allclose(out2, ref, atol=3e-3, rtol=3e-3), float(jnp.max(jnp.abs(out2 - ref)))

    print("KERNEL_OK")
</pallas_src>

<mosaic_0001>
module attributes {stable_mosaic.version = 11 : i64} {
  func.func @_rmsnorm_matmul_kernel(%arg0: i32, %arg1: i32, %arg2: memref<16x128xf32, #tpu.memory_space<vmem>>, %arg3: memref<1x128xf32, #tpu.memory_space<vmem>>, %arg4: memref<128x384xf32, #tpu.memory_space<vmem>>, %arg5: memref<1x384xf32, #tpu.memory_space<vmem>>, %arg6: memref<16x384xf32, #tpu.memory_space<vmem>>) attributes {dimension_semantics = [#tpu.dimension_semantics<parallel>, #tpu.dimension_semantics<parallel>], iteration_bounds = array<i64: 1, 1>, scalar_prefetch = 0 : i64, scratch_operands = 0 : i64, tpu.core_type = #tpu.core_type<tc>, window_params = [{transform_indices = @transform_0, window_bounds = array<i64: 16, 128>}, {pipeline_mode = #tpu.pipeline_mode<synchronous>, transform_indices = @transform_1, window_bounds = array<i64: 1, 128>}, {transform_indices = @transform_2, window_bounds = array<i64: 128, 384>}, {transform_indices = @transform_3, window_bounds = array<i64: 1, 384>}, {transform_indices = @transform_4, window_bounds = array<i64: 16, 384>}]} {
    %c0 = arith.constant 0 : index
    %c0_0 = arith.constant 0 : index
    %0 = vector.load %arg2[%c0, %c0_0] : memref<16x128xf32, #tpu.memory_space<vmem>>, vector<16x128xf32>
    %1 = arith.mulf %0, %0 : vector<16x128xf32>
    %cst = arith.constant dense<0.000000e+00> : vector<16xf32>
    %2 = vector.multi_reduction <add>, %1, %cst [1] : vector<16x128xf32> to vector<16xf32>
    %3 = vector.shape_cast %2 : vector<16xf32> to vector<16x1xf32>
    %cst_1 = arith.constant 1.280000e+02 : f32
    %4 = vector.broadcast %cst_1 : f32 to vector<16x1xf32>
    %5 = arith.divf %3, %4 : vector<16x1xf32>
    %cst_2 = arith.constant 9.99999997E-7 : f32
    %6 = vector.broadcast %cst_2 : f32 to vector<16x1xf32>
    %7 = arith.addf %5, %6 : vector<16x1xf32>
    %8 = math.rsqrt %7 : vector<16x1xf32>
    %9 = vector.broadcast %8 : vector<16x1xf32> to vector<16x128xf32>
    %10 = arith.mulf %0, %9 : vector<16x128xf32>
    %c0_3 = arith.constant 0 : index
    %c0_4 = arith.constant 0 : index
    %11 = vector.load %arg3[%c0_3, %c0_4] : memref<1x128xf32, #tpu.memory_space<vmem>>, vector<1x128xf32>
    %12 = vector.broadcast %11 : vector<1x128xf32> to vector<16x128xf32>
    %13 = arith.mulf %10, %12 : vector<16x128xf32>
    %c0_5 = arith.constant 0 : index
    %c0_6 = arith.constant 0 : index
    %14 = vector.load %arg4[%c0_5, %c0_6] : memref<128x384xf32, #tpu.memory_space<vmem>>, vector<128x384xf32>
    %cst_7 = arith.constant dense<0.000000e+00> : vector<16x384xf32>
    %15 = tpu.matmul %13, %14, %cst_7 {dimension_numbers = #tpu.dot_dimension_numbers<[1], [0], [0], [1], [0, 0, 1, 1], [], []>} : vector<16x128xf32>, vector<128x384xf32>, vector<16x384xf32> -> vector<16x384xf32>
    %c0_8 = arith.constant 0 : index
    %c0_9 = arith.constant 0 : index
    %16 = vector.load %arg5[%c0_8, %c0_9] : memref<1x384xf32, #tpu.memory_space<vmem>>, vector<1x384xf32>
    %17 = vector.broadcast %16 : vector<1x384xf32> to vector<16x384xf32>
    %18 = arith.addf %15, %17 : vector<16x384xf32>
    %c0_10 = arith.constant 0 : index
    %c0_11 = arith.constant 0 : index
    %19 = vector.load %arg6[%c0_10, %c0_11] : memref<16x384xf32, #tpu.memory_space<vmem>>, vector<16x384xf32>
    tpu.vector_store %arg6[%c0_10, %c0_11], %18 {strides = array<i32>} : memref<16x384xf32, #tpu.memory_space<vmem>>, vector<16x384xf32>,
    return
  }
  func.func @transform_0(%arg0: i32, %arg1: i32) -> (i32, i32) {
    %c0_i32 = arith.constant 0 : i32
    %c0_i32_0 = arith.constant 0 : i32
    return %arg0, %c0_i32 : i32, i32
  }
  func.func @transform_1(%arg0: i32, %arg1: i32) -> (i32, i32) {
    %c0_i32 = arith.constant 0 : i32
    %c0_i32_0 = arith.constant 0 : i32
    %c0_i32_1 = arith.constant 0 : i32
    return %c0_i32, %c0_i32_0 : i32, i32
  }
  func.func @transform_2(%arg0: i32, %arg1: i32) -> (i32, i32) {
    %c0_i32 = arith.constant 0 : i32
    %c0_i32_0 = arith.constant 0 : i32
    return %c0_i32, %arg1 : i32, i32
  }
  func.func @transform_3(%arg0: i32, %arg1: i32) -> (i32, i32) {
    %c0_i32 = arith.constant 0 : i32
    %c0_i32_0 = arith.constant 0 : i32
    return %c0_i32, %arg1 : i32, i32
  }
  func.func @transform_4(%arg0: i32, %arg1: i32) -> (i32, i32) {
    %c0_i32 = arith.constant 0 : i32
    return %arg0, %arg1 : i32, i32
  }
}

</mosaic_0001>

<bundles_post_ra>
// kernel: tpu_custom_call.1
= control target key start
LH: loop header
LB: loop body
LE: loop exit
PB: predicated region body
PF: predicated region fallthrough
CT: control target
= control target key end

     0   :  { %9 = vsyncpa [#allocation3], 0  ;;  %s510_s0 = inlined_call_operand.hbm [shape: f32[16,128], index: 0, kind: input, shape index: {}]   ;;  %s511_s1 = inlined_call_operand.hbm [shape: f32[1,128], index: 1, kind: input, shape index: {}]   ;;  %s512_s2 = inlined_call_operand.hbm [shape: f32[128,384], index: 2, kind: input, shape index: {}]   ;;  %s513_s3 = inlined_call_operand.hbm [shape: f32[1,384], index: 3, kind: input, shape index: {}]   ;;  %s514_s4 = inlined_call_operand.hbm [shape: f32[16,384], index: 4, kind: output, shape index: {}]  }
   0x1   :  { %10 = vsyncpa [#allocation6], 0 }
   0x2   :  { %11 = vsyncpa [#allocation9], 0  ;;  %s31_s17 = sshll.u32 %s511_s1, 4  ;;  %s32_s17 = int_to_ptr.hbm [resolvable:$true] %s31_s17 }
   0x3   :  { %12 = vsyncpa [#allocation4], 0  ;;  %s437_s18 = smov [#allocation5]   ;;  %s17_s22 = sshll.u32 %s510_s0, 4  ;;  %s18_s22 = int_to_ptr.hbm [resolvable:$true] %s17_s22 }
   0x4   :  { %s33_s19 = sshll.u32 %s437_s18, 4  ;;  %s438_s23 = smov [#allocation2]   ;;  %s34_s19 = int_to_ptr.vmem [resolvable:$true] %s33_s19 }
   0x5   :  { %36 = dma.hbm_to_vmem [thread:$0]  %s32_s17, 16, %s34_s19, [#allocation6]  }
   0x6   :  { %s19_s24 = sshll.u32 %s438_s23, 4  ;;  %s439_s25 = smov 128   ;;  %s20_s24 = int_to_ptr.vmem [resolvable:$true] %s19_s24 }
   0x7   :  { %s440_s26 = smov 8   ;;  %s41_s1 = sshll.u32 %s512_s2, 4  ;;  %s42_s1 = int_to_ptr.hbm [resolvable:$true] %s41_s1 }
   0x8   :  { %25 = dma.hbm_to_vmem [thread:$0]  %s18_s22, 256, %s20_s24, [#allocation3], %s439_s25, %s439_s25, %s440_s26  }
   0x9   :  { %s441_s29 = smov [#allocation7]   ;;  %s55_s0 = sshll.u32 %s513_s3, 4  ;;  %s56_s0 = int_to_ptr.hbm [resolvable:$true] %s55_s0 }
   0xa   :  { %s43_s30 = sshll.u32 %s441_s29, 4  ;;  %s442_s7 = smov 384   ;;  %s44_s30 = int_to_ptr.vmem [resolvable:$true] %s43_s30 }
   0xb   :  { %s443_s8 = smov 24   ;;  %s444_s9 = smov [#allocation8]  }
   0xc   :  { %49 = dma.hbm_to_vmem [thread:$0]  %s42_s1, 6144, %s44_s30, [#allocation6], %s442_s7, %s442_s7, %s443_s8  }
   0xd   :  { %s57_s10 = sshll.u32 %s444_s9, 4  ;;  %s58_s10 = int_to_ptr.vmem [resolvable:$true] %s57_s10 }
   0xe   :  { %60 = dma.hbm_to_vmem [thread:$0]  %s56_s0, 48, %s58_s10, [#allocation9]  }
   0xf   :  { %429 = dma.done.wait [#allocation3], 256  }
  0x10   :  { %430 = vsyncadd [#allocation3], 4294967040 }
  0x11   :  { %431 = dma.done.wait [#allocation6], 6160  }
  0x12   :  { %432 = vsyncadd [#allocation6], 4294961136 }
  0x13   :  { %433 = dma.done.wait [#allocation9], 48  }
  0x14   :  { %434 = vsyncadd [#allocation9], 4294967248  ;;  %v487_v0 = vld [vmem:[#allocation2] sm:$0xff]  ;;  %v171_v4 = vld [vmem:[#allocation7 + $0x178] sm:$0xff]  ;;  %v445_v19 = vmov 128.0   ;;  %s446_s2 = smov [#allocation10]  }
  0x15   :  { %v169_v1 = vld [vmem:[#allocation7 + $0x168] sm:$0xff]  ;;  %v79_v2 = vmul.f32 %v487_v0, %v487_v0  ;;  %v170_v3 = vld [vmem:[#allocation7 + $0x170] sm:$0xff]  ;;  %226 = vmatpush.msra.mxu2 %v171_v4  ;;  %v167_v6 = vld [vmem:[#allocation7 + $0x158] sm:$0xff]  ;;  %303 = vrcp.f32 %v445_v19  ;;  %s259_s3 = sshll.u32 %s446_s2, 4  ;;  %s261_s13 = sshll.u32 %s514_s4, 4  ;;  %s260_s3 = int_to_ptr.vmem [resolvable:$true] %s259_s3  ;;  %s262_s13 = int_to_ptr.hbm [resolvable:$true] %s261_s13 }
  0x16   :  { %180 = vmatpush.msra.mxu0 %v169_v1  ;;  %v166_v5 = vld [vmem:[#allocation7 + $0x150] sm:$0xff]  ;;  %276 = vmatpush.msra.mxu3 %v169_v1  ;;  %v168_v7 = vld [vmem:[#allocation7 + $0x160] sm:$0xff]  ;;  %v163_v8 = vld [vmem:[#allocation7 + $0x138] sm:$0xff] }
  0x17   :  { %203 = vmatpush.msra.mxu1 %v170_v3  ;;  %81 = vadd.xlane.f32.xlu0 %v79_v2  ;;  %v164_v9 = vld [vmem:[#allocation7 + $0x140] sm:$0xff]  ;;  %v165_v10 = vld [vmem:[#allocation7 + $0x148] sm:$0xff]  ;;  %v491_v11 = vld [vmem:[#allocation2 + $0x8] sm:$0xff] }
  0x18   :  { %181 = vmatpush.msra.mxu0 %v166_v5  ;;  %227 = vmatpush.msra.mxu2 %v168_v7  ;;  %v80_v12 = vmul.f32 %v491_v11, %v491_v11  ;;  %v160_v13 = vld [vmem:[#allocation7 + $0x120] sm:$0xff]  ;;  %v161_v14 = vld [vmem:[#allocation7 + $0x128] sm:$0xff]  ;;  %v162_v15 = vld [vmem:[#allocation7 + $0x130] sm:$0xff] }
  0x19   :  { %204 = vmatpush.msra.mxu1 %v167_v6  ;;  %277 = vmatpush.msra.mxu3 %v166_v5  ;;  %v157_v16 = vld [vmem:[#allocation7 + $0x108] sm:$0xff]  ;;  %v158_v17 = vld [vmem:[#allocation7 + $0x110] sm:$0xff]  ;;  %v159_v18 = vld [vmem:[#allocation7 + $0x118] sm:$0xff] }
  0x1a   :  { %182 = vmatpush.msra.mxu0 %v163_v8  ;;  %228 = vmatpush.msra.mxu2 %v165_v10  ;;  %v154_v20 = vld [vmem:[#allocation7 + $0xf0] sm:$0xff]  ;;  %v155_v21 = vld [vmem:[#allocation7 + $0xf8] sm:$0xff]  ;;  %v156_v22 = vld [vmem:[#allocation7 + $0x100] sm:$0xff] }
  0x1b   :  { %205 = vmatpush.msra.mxu1 %v164_v9  ;;  %278 = vmatpush.msra.mxu3 %v163_v8  ;;  %v151_v23 = vld [vmem:[#allocation7 + $0xd8] sm:$0xff]  ;;  %v152_v24 = vld [vmem:[#allocation7 + $0xe0] sm:$0xff]  ;;  %v153_v25 = vld [vmem:[#allocation7 + $0xe8] sm:$0xff]  ;;  %v495_v29 = vpop.eup %303 }
  0x1c   :  { %183 = vmatpush.msra.mxu0 %v160_v13  ;;  %229 = vmatpush.msra.mxu2 %v162_v15  ;;  %v148_v26 = vld [vmem:[#allocation7 + $0xc0] sm:$0xff]  ;;  %v149_v27 = vld [vmem:[#allocation7 + $0xc8] sm:$0xff]  ;;  %v150_v28 = vld [vmem:[#allocation7 + $0xd0] sm:$0xff]  ;;  %v86_v36 = vmul.f32 128.0, %v495_v29  ;;  %vm90_vm0 = vweird.f32 %v495_v29 }
  0x1d   :  { %206 = vmatpush.msra.mxu1 %v161_v14  ;;  %279 = vmatpush.msra.mxu3 %v160_v13  ;;  %v145_v30 = vld [vmem:[#allocation7 + $0xa8] sm:$0xff]  ;;  %v146_v31 = vld [vmem:[#allocation7 + $0xb0] sm:$0xff]  ;;  %v147_v32 = vld [vmem:[#allocation7 + $0xb8] sm:$0xff] }
  0x1e   :  { %184 = vmatpush.msra.mxu0 %v157_v16  ;;  %230 = vmatpush.msra.mxu2 %v159_v18  ;;  %v142_v33 = vld [vmem:[#allocation7 + $0x90] sm:$0xff]  ;;  %v143_v34 = vld [vmem:[#allocation7 + $0x98] sm:$0xff]  ;;  %v144_v35 = vld [vmem:[#allocation7 + $0xa0] sm:$0xff]  ;;  %v87_v43 = vsub.f32 1.0, %v86_v36 }
  0x1f   :  { %83 = vadd.xlane.f32.xlu0 %v80_v12  ;;  %207 = vmatpush.msra.mxu1 %v158_v17  ;;  %v139_v37 = vld [vmem:[#allocation7 + $0x78] sm:$0xff]  ;;  %v140_v38 = vld [vmem:[#allocation7 + $0x80] sm:$0xff]  ;;  %v141_v39 = vld [vmem:[#allocation7 + $0x88] sm:$0xff] }
  0x20   :  { %280 = vmatpush.msra.mxu3 %v157_v16  ;;  %185 = vmatpush.msra.mxu0 %v154_v20  ;;  %v136_v40 = vld [vmem:[#allocation7 + $0x60] sm:$0xff]  ;;  %v137_v41 = vld [vmem:[#allocation7 + $0x68] sm:$0xff]  ;;  %v138_v42 = vld [vmem:[#allocation7 + $0x70] sm:$0xff]  ;;  %v88_v50 = vmul.f32 %v495_v29, %v87_v43 }
  0x21   :  { %208 = vmatpush.msra.mxu1 %v155_v21  ;;  %231 = vmatpush.msra.mxu2 %v156_v22  ;;  %v133_v44 = vld [vmem:[#allocation7 + $0x48] sm:$0xff]  ;;  %v134_v45 = vld [vmem:[#allocation7 + $0x50] sm:$0xff]  ;;  %v135_v46 = vld [vmem:[#allocation7 + $0x58] sm:$0xff] }
  0x22   :  { %281 = vmatpush.msra.mxu3 %v154_v20  ;;  %186 = vmatpush.msra.mxu0 %v151_v23  ;;  %v130_v47 = vld [vmem:[#allocation7 + $0x30] sm:$0xff]  ;;  %v131_v48 = vld [vmem:[#allocation7 + $0x38] sm:$0xff]  ;;  %v132_v49 = vld [vmem:[#allocation7 + $0x40] sm:$0xff]  ;;  %v89_v57 = vadd.f32 %v495_v29, %v88_v50 }
  0x23   :  { %209 = vmatpush.msra.mxu1 %v152_v24  ;;  %232 = vmatpush.msra.mxu2 %v153_v25  ;;  %v127_v51 = vld [vmem:[#allocation7 + $0x18] sm:$0xff]  ;;  %v128_v52 = vld [vmem:[#allocation7 + $0x20] sm:$0xff]  ;;  %v129_v53 = vld [vmem:[#allocation7 + $0x28] sm:$0xff] }
  0x24   :  { %282 = vmatpush.msra.mxu3 %v151_v23  ;;  %187 = vmatpush.msra.mxu0 %v148_v26  ;;  %v124_v54 = vld [vmem:[#allocation7] sm:$0xff]  ;;  %v125_v55 = vld [vmem:[#allocation7 + $0x8] sm:$0xff]  ;;  %v126_v56 = vld [vmem:[#allocation7 + $0x10] sm:$0xff]  ;;  %v91_v58 = vsel %vm90_vm0, %v495_v29, %v89_v57 }
  0x25   :  { %210 = vmatpush.msra.mxu1 %v149_v27  ;;  %233 = vmatpush.msra.mxu2 %v150_v28  ;;  %v302_v10 = vld [vmem:[#allocation5] ss:$0 sm:$0xff]  ;;  %v172_v22 = vld [vmem:[#allocation8] sm:$0x7] }
  0x26   :  { %283 = vmatpush.msra.mxu3 %v148_v26  ;;  %188 = vmatpush.msra.mxu0 %v145_v30  ;;  %v174_v23 = vperm.slane %v172_v22, 0  ;;  %v176_v28 = vperm.slane %v172_v22, 2 }
  0x27   :  { %211 = vmatpush.msra.mxu1 %v146_v31  ;;  %234 = vmatpush.msra.mxu2 %v147_v32 }
  0x28   :  { %284 = vmatpush.msra.mxu3 %v145_v30  ;;  %189 = vmatpush.msra.mxu0 %v142_v33 }
  0x29   :  { %212 = vmatpush.msra.mxu1 %v143_v34  ;;  %235 = vmatpush.msra.mxu2 %v144_v35 }
  0x2a   :  { %285 = vmatpush.msra.mxu3 %v142_v33  ;;  %190 = vmatpush.msra.mxu0 %v139_v37 }
  0x2b   :  { %213 = vmatpush.msra.mxu1 %v140_v38  ;;  %236 = vmatpush.msra.mxu2 %v141_v39 }
  0x2c   :  { %286 = vmatpush.msra.mxu3 %v139_v37  ;;  %191 = vmatpush.msra.mxu0 %v136_v40 }
  0x2d   :  { %214 = vmatpush.msra.mxu1 %v137_v41  ;;  %237 = vmatpush.msra.mxu2 %v138_v42 }
  0x2e   :  { %287 = vmatpush.msra.mxu3 %v136_v40  ;;  %192 = vmatpush.msra.mxu0 %v133_v44 }
  0x2f   :  { %215 = vmatpush.msra.mxu1 %v134_v45  ;;  %238 = vmatpush.msra.mxu2 %v135_v46 }
  0x30   :  { %288 = vmatpush.msra.mxu3 %v133_v44  ;;  %193 = vmatpush.msra.mxu0 %v130_v47 }
  0x31   :  { %216 = vmatpush.msra.mxu1 %v131_v48  ;;  %239 = vmatpush.msra.mxu2 %v132_v49 }
  0x32   :  { %289 = vmatpush.msra.mxu3 %v130_v47  ;;  %194 = vmatpush.msra.mxu0 %v127_v51 }
  0x33   :  { %217 = vmatpush.msra.mxu1 %v128_v52  ;;  %240 = vmatpush.msra.mxu2 %v129_v53 }
  0x34   :  { %290 = vmatpush.msra.mxu3 %v127_v51  ;;  %195 = vmatpush.msra.mxu0 %v124_v54 }
  0x35   :  { %218 = vmatpush.msra.mxu1 %v125_v55  ;;  %241 = vmatpush.msra.mxu2 %v126_v56 }
  0x36   :  { %291 = vmatpush.msra.mxu3 %v124_v54 }
  0x8a   :  { %v82_v59 = vpop.xlane.xlu0 %81 }
  0x8b   :  { %v92_v60 = vmul.f32 %v91_v58, %v82_v59 }
  0x8d   :  { %v94_v61 = vadd.f32 1e-06, %v92_v60 }
  0x8f   :  { %305 = vrsqrt.f32 %v94_v61  ;;  %vm102_vm2 = vweird.f32 %v94_v61 }
  0x92   :  { %v84_v62 = vpop.xlane.xlu0 %83 }
  0x93   :  { %v93_v63 = vmul.f32 %v91_v58, %v84_v62 }
  0x95   :  { %v306_v1 = vpop.eup %305  ;;  %v95_v2 = vadd.f32 1e-06, %v93_v63 }
  0x96   :  { %v97_v3 = vmul.f32 %v306_v1, %v94_v61  ;;  %vm103_vm1 = vweird.f32 %v306_v1 }
  0x97   :  { %307 = vrsqrt.f32 %v95_v2  ;;  %vm104_vm3 = vmor %vm102_vm2, %vm103_vm1  ;;  %vm112_vm5 = vweird.f32 %v95_v2 }
  0x98   :  { %v98_v4 = vmul.f32 %v306_v1, %v97_v3 }
  0x9a   :  { %v99_v5 = vmul.f32 0.5, %v98_v4 }
  0x9c   :  { %v100_v6 = vsub.f32 1.5, %v99_v5 }
  0x9d   :  { %v308_v7 = vpop.eup %307 }
  0x9e   :  { %v101_v8 = vmul.f32 %v306_v1, %v100_v6  ;;  %v107_v9 = vmul.f32 %v308_v7, %v95_v2  ;;  %vm113_vm4 = vweird.f32 %v308_v7 }
  0x9f   :  { %vm114_vm6 = vmor %vm112_vm5, %vm113_vm4 }
  0xa0   :  { %v108_v12 = vmul.f32 %v308_v7, %v107_v9  ;;  %v105_v13 = vsel %vm104_vm3, %v306_v1, %v101_v8 }
  0xa1   :  { %v116_v14 = vmul.f32 %v105_v13, %v487_v0  ;;  %v175_v0 = vperm.slane %v172_v22, 1 }
  0xa2   :  { %v109_v15 = vmul.f32 0.5, %v108_v12 }
  0xa3   :  { %v122_v16 = vmul.f32 %v302_v10, %v116_v14 }
  0xa4   :  { %v110_v17 = vsub.f32 1.5, %v109_v15 }
  0xa5   :  { %196 = vmatmul.f32.vlgmr.msra.gmra.mxu0 %v122_v16  ;;  %219 = vmatmul.f32.vlgmr.msra.gmra.mxu1 %v122_v16 }
  0xa6   :  { %v111_v18 = vmul.f32 %v308_v7, %v110_v17  ;;  %242 = vmatmul.f32.vlgmr.msra.gmra.mxu2 %v122_v16 }
  0xa8   :  { %v115_v19 = vsel %vm114_vm6, %v308_v7, %v111_v18 }
  0xa9   :  { %v117_v20 = vmul.f32 %v115_v19, %v491_v11 }
  0xab   :  { %v123_v21 = vmul.f32 %v302_v10, %v117_v20 }
  0xad   :  { %199 = vmatmul.f32.vlgmr.msra.gmra.mxu3 %v123_v21  ;;  %222 = vmatmul.f32.gmra.mxu1 %v123_v21 }
  0xae   :  { %245 = vmatmul.f32.gmra.mxu2 %v123_v21 }
 0x122   :  { %v197_v24 = vpop.f32.mrf.mxu0  ;;  %v220_v25 = vpop.f32.mrf.mxu1 }
 0x123   :  { %v198_v26 = vadd.f32 %v197_v24, %v174_v23  ;;  %v221_v27 = vadd.f32 %v220_v25, %v175_v0 }
 0x125   :  { %249 = vst [vmem:[#allocation10] sm:$0xff] %v198_v26 }
 0x126   :  { %250 = vst [vmem:[#allocation10 + $0x8] sm:$0xff] %v221_v27 }
 0x129   :  { %v243_v29 = vpop.f32.mrf.mxu2 }
 0x12a   :  { %v244_v30 = vadd.f32 %v243_v29, %v176_v28  ;;  %v223_v31 = vpop.f32.mrf.mxu1 }
 0x12b   :  { %v224_v32 = vadd.f32 %v223_v31, %v175_v0 }
 0x12c   :  { %251 = vst [vmem:[#allocation10 + $0x10] sm:$0xff] %v244_v30 }
 0x12d   :  { %253 = vst [vmem:[#allocation10 + $0x20] sm:$0xff] %v224_v32 }
 0x130   :  { %v200_v11 = vpop.f32.mrf.mxu3 }
 0x131   :  { %v201_v33 = vadd.f32 %v200_v11, %v174_v23  ;;  %v246_v34 = vpop.f32.mrf.mxu2 }
 0x132   :  { %v247_v35 = vadd.f32 %v246_v34, %v176_v28 }
 0x133   :  { %252 = vst [vmem:[#allocation10 + $0x18] sm:$0xff] %v201_v33 }
 0x134   :  { %254 = vst [vmem:[#allocation10 + $0x28] sm:$0xff] %v247_v35 }
 0x135   :  { %267 = dma.vmem_to_hbm [thread:$0]  %s260_s3, 768, %s262_s13, [#allocation4], %s442_s7, %s442_s7, %s443_s8  }
 0x136   :  { %435 = dma.done.wait [#allocation4], 768  }
 0x137   :  { %436 = vsyncadd [#allocation4], 4294966528 }
 0x138   :  { %272 = vsyncpa [#allocation3], 1 }
 0x139   :  { %273 = vsyncpa [#allocation6], 1 }
 0x13a   :  { %274 = vsyncpa [#allocation9], 1 }
 0x13b   :  { %275 = vsyncpa [#allocation4], 1 }

</bundles_post_ra>
